<compile_context>
chip_gen: v5e
topology: v5e:2x2
jax: 0.10.0
libtpu: 0.0.40
codegen_flags: <defaults>
</compile_context>

<pallas_src>
import functools

import jax
import jax.numpy as jnp
from jax.experimental import pallas as pl
from jax.experimental.pallas import tpu as pltpu


def _round_up(x, m):
    return pl.cdiv(x, m) * m


def _vmem_capacity_bytes():
    """Per-core VMEM capacity; conservative 64 MiB fallback (v7x)."""
    try:
        info = pltpu.get_tpu_info()
        for attr in ("vmem_capacity_bytes", "vmem_size_bytes", "vmem_bytes"):
            cap = getattr(info, attr, None)
            if cap:
                return int(cap)
    except Exception:
        pass
    return 64 * 1024 * 1024


def _choose_tile_m(n, d, k_pad, x_item, out_item, budget_bytes, max_tile=1024):
    """Largest tile_m (multiple of 16, <= max_tile) fitting the VMEM budget."""
    fixed = (d * k_pad + k_pad) * 4                  # clusters^T + ||c||^2 (1 buf)
    per_row = (2 * d * x_item                        # x tile, double-buffered
               + 2 * k_pad * out_item                # q tile, double-buffered
               + 2 * k_pad * 4)                      # f32 temporaries (x@c, q)
    avail = max(budget_bytes - fixed, per_row * 16)
    tm = min(max_tile, avail // per_row)

    # Keep >= 4 grid steps for large batches (megacore sharding on v7x plus
    # DMA/compute overlap), without shrinking tiles below ~256 rows.
    min_tiles = 4
    if n >= min_tiles * 256:
        tm = min(tm, _round_up(pl.cdiv(n, min_tiles), 16))

    tm = max(16, (int(tm) // 16) * 16)
    tm = min(tm, int(_round_up(n, 16)))
    return int(tm)


def _dec_kernel(x_ref, c_ref, c2_ref, q_ref, *, alpha):
    # x_ref : (TM, D)   current batch tile (native dtype; upcast here)
    # c_ref : (D, Kp)   clusters, pre-transposed, zero-padded to Kp lanes
    # c2_ref: (1, Kp)   precomputed ||c_j||^2 (1e30 in padded columns)
    # q_ref : (TM, Kp)  output soft assignments (padded cols ~0)
    x = x_ref[...].astype(jnp.float32)
    c = c_ref[...]
    c2 = c2_ref[...]

    x2 = jnp.sum(x * x, axis=1, keepdims=True)                      # (TM, 1)
    xc = jnp.dot(x, c, preferred_element_type=jnp.float32)          # MXU
    dist = jnp.maximum(x2 + c2 - 2.0 * xc, 0.0)                     # ||x-c||^2

    inv_alpha = 1.0 / alpha
    t = 1.0 + dist * inv_alpha
    p = (alpha + 1.0) * 0.5                                         # t^(-p)
    if p == 1.0:
        q = pl.reciprocal(t, approx=True)
    elif p == 0.5:
        q = jax.lax.rsqrt(t)
    elif p == 1.5:
        q = pl.reciprocal(t, approx=True) * jax.lax.rsqrt(t)
    elif p == 2.0:
        r = pl.reciprocal(t, approx=True)
        q = r * r
    else:
        q = jnp.exp(-p * jnp.log1p(dist * inv_alpha))

    denom = jnp.sum(q, axis=1, keepdims=True)
    q = q * pl.reciprocal(denom)          # exact reciprocal: rows sum to 1
    q_ref[...] = q.astype(q_ref.dtype)


def dec_layer(inputs, clusters, *, alpha=1.0, tile_m=None, out_dtype=None,
              return_padded_k=False):
    """Pallas DEC soft-assignment.

    inputs:   (N, D) array (any float dtype; bf16 recommended for bandwidth)
    clusters: (K, D) array
    Returns (N, K) soft assignments (or (N, K_pad) if return_padded_k=True).
    """
    n, d = inputs.shape
    k, d2 = clusters.shape
    assert d == d2, "feature dims must match"
    alpha = float(alpha)
    out_dtype = jnp.dtype(out_dtype) if out_dtype is not None else jnp.dtype(inputs.dtype)

    # Lane-dense K: pad the cluster axis up to a multiple of 128.
    k_pad = int(_round_up(k, 128))
    x_item = jnp.dtype(inputs.dtype).itemsize
    out_item = out_dtype.itemsize

    cap = _vmem_capacity_bytes()
    budget = min(40 * 1024 * 1024, int(0.4 * cap))     # ~25.6 MiB on v7x, 40 MiB on v5e/v6e
    if tile_m is None:
        tile_m = _choose_tile_m(n, d, k_pad, x_item, out_item, budget)
    tile_m = max(16, (int(tile_m) // 16) * 16)

    grid = (int(pl.cdiv(n, tile_m)),)                  # ragged last tile, no batch pad

    # Grid-invariant cluster prep (tiny: K x D).
    c_f32 = clusters.astype(jnp.float32)
    c_dk = jnp.pad(c_f32.T, ((0, 0), (0, k_pad - k)))                       # (D, Kp)
    # Padded columns get a huge ||c||^2 so their q underflows to ~0 and the
    # row sum is unaffected -- no per-tile masking needed in the kernel.
    c2 = jnp.pad(jnp.sum(c_f32 * c_f32, axis=1)[None, :],
                 ((0, 0), (0, k_pad - k)), constant_values=1e30)            # (1, Kp)

    kernel = functools.partial(_dec_kernel, alpha=alpha)

    def _call(single_buffer_invariants):
        inv_kwargs = ({"pipeline_mode": pl.Buffered(1)}
                      if single_buffer_invariants else {})
        inv_factor = 1 if single_buffer_invariants else 2
        vmem_used = (2 * tile_m * d * x_item                 # x, double-buffered
                     + 2 * tile_m * k_pad * out_item         # q, double-buffered
                     + inv_factor * (d * k_pad + k_pad) * 4  # clusters^T + ||c||^2
                     + 2 * tile_m * k_pad * 4)               # in-kernel f32 temporaries
        vmem_limit = max(int(vmem_used * 1.25) + (4 << 20), 16 << 20)
        vmem_limit = min(vmem_limit, int(0.75 * cap))        # headroom on v7x's 64 MiB

        return pl.pallas_call(
            kernel,
            out_shape=jax.ShapeDtypeStruct((n, k_pad), out_dtype),
            grid=grid,
            in_specs=[
                pl.BlockSpec((tile_m, d), lambda i: (i, 0)),                 # x tile
                pl.BlockSpec((d, k_pad), lambda i: (0, 0), **inv_kwargs),    # clusters^T
                pl.BlockSpec((1, k_pad), lambda i: (0, 0), **inv_kwargs),    # ||c||^2
            ],
            out_specs=pl.BlockSpec((tile_m, k_pad), lambda i: (i, 0)),
            compiler_params=pltpu.CompilerParams(
                dimension_semantics=("parallel",),
                vmem_limit_bytes=int(vmem_limit),
            ),
        )(inputs, c_dk, c2)

    try:
        q_full = _call(True)
    except Exception:
        # Older jax / unsupported Buffered(1): fall back to default buffering.
        q_full = _call(False)

    if return_padded_k or k_pad == k:
        return q_full
    return q_full[:, :k]


def _xavier_uniform(key, shape):
    # matches torch.nn.init.xavier_uniform_ for a 2-D (fan_out, fan_in) tensor
    fan_out, fan_in = shape
    bound = (6.0 / (fan_in + fan_out)) ** 0.5
    return jax.random.uniform(key, shape, jnp.float32, minval=-bound, maxval=bound)


def _reference(inputs, clusters, alpha=1.0):
    # pure-JAX reference mirroring the PyTorch forward exactly
    x = inputs.astype(jnp.float32)
    c = clusters.astype(jnp.float32)
    diff = x[:, None, :] - c[None, :, :]
    q = 1.0 / (1.0 + jnp.sum(diff * diff, axis=2) / alpha)
    q = q ** ((alpha + 1.0) / 2.0)
    return q / jnp.sum(q, axis=1, keepdims=True)


if __name__ == "__main__":
    key = jax.random.PRNGKey(0)
    k_x, k_c, k_x2 = jax.random.split(key, 3)

    # Case 1: canonical DEC shapes, alpha = 1 (PyTorch default).
    N, D, K = 64, 32, 8
    x = jax.random.normal(k_x, (N, D), jnp.float32)
    clusters = _xavier_uniform(k_c, (K, D))

    q = jax.block_until_ready(dec_layer(x, clusters, alpha=1.0))
    q_ref = _reference(x, clusters, 1.0)
    assert q.shape == (N, K)
    assert jnp.allclose(q, q_ref, rtol=2e-3, atol=2e-3), "mismatch vs reference (alpha=1)"
    assert jnp.allclose(jnp.sum(q, axis=1), 1.0, atol=1e-3), "rows must sum to 1"

    # Case 2: ragged batch (exercises the overhanging last tile) + alpha != 1.
    N2 = 50
    x2 = jax.random.normal(k_x2, (N2, D), jnp.float32)
    q2 = jax.block_until_ready(dec_layer(x2, clusters, alpha=2.0))
    q2_ref = _reference(x2, clusters, 2.0)
    assert q2.shape == (N2, K)
    assert jnp.allclose(q2, q2_ref, rtol=2e-3, atol=2e-3), "mismatch vs reference (alpha=2)"
    assert jnp.allclose(jnp.sum(q2, axis=1), 1.0, atol=1e-3), "rows must sum to 1"

    print("KERNEL_OK")
</pallas_src>

<mosaic_0001>
module attributes {stable_mosaic.version = 11 : i64} {
  func.func @_dec_kernel(%arg0: i32, %arg1: memref<64x32xf32, #tpu.memory_space<vmem>>, %arg2: memref<32x128xf32, #tpu.memory_space<vmem>>, %arg3: memref<1x128xf32, #tpu.memory_space<vmem>>, %arg4: memref<64x128xf32, #tpu.memory_space<vmem>>) attributes {dimension_semantics = [#tpu.dimension_semantics<parallel>], iteration_bounds = array<i64: 1>, scalar_prefetch = 0 : i64, scratch_operands = 0 : i64, tpu.core_type = #tpu.core_type<tc>, window_params = [{transform_indices = @transform_0, window_bounds = array<i64: 64, 32>}, {pipeline_mode = #tpu.pipeline_mode<synchronous>, transform_indices = @transform_1, window_bounds = array<i64: 32, 128>}, {pipeline_mode = #tpu.pipeline_mode<synchronous>, transform_indices = @transform_2, window_bounds = array<i64: 1, 128>}, {transform_indices = @transform_3, window_bounds = array<i64: 64, 128>}]} {
    %c0 = arith.constant 0 : index
    %c0_0 = arith.constant 0 : index
    %0 = vector.load %arg1[%c0, %c0_0] : memref<64x32xf32, #tpu.memory_space<vmem>>, vector<64x32xf32>
    %c0_1 = arith.constant 0 : index
    %c0_2 = arith.constant 0 : index
    %1 = vector.load %arg2[%c0_1, %c0_2] : memref<32x128xf32, #tpu.memory_space<vmem>>, vector<32x128xf32>
    %c0_3 = arith.constant 0 : index
    %c0_4 = arith.constant 0 : index
    %2 = vector.load %arg3[%c0_3, %c0_4] : memref<1x128xf32, #tpu.memory_space<vmem>>, vector<1x128xf32>
    %3 = arith.mulf %0, %0 : vector<64x32xf32>
    %cst = arith.constant dense<0.000000e+00> : vector<64xf32>
    %4 = vector.multi_reduction <add>, %3, %cst [1] : vector<64x32xf32> to vector<64xf32>
    %5 = vector.shape_cast %4 : vector<64xf32> to vector<64x1xf32>
    %cst_5 = arith.constant dense<0.000000e+00> : vector<64x128xf32>
    %6 = tpu.matmul %0, %1, %cst_5 {dimension_numbers = #tpu.dot_dimension_numbers<[1], [0], [0], [1], [0, 0, 1, 1], [], []>} : vector<64x32xf32>, vector<32x128xf32>, vector<64x128xf32> -> vector<64x128xf32>
    %7 = vector.broadcast %5 : vector<64x1xf32> to vector<64x128xf32>
    %8 = vector.broadcast %2 : vector<1x128xf32> to vector<64x128xf32>
    %9 = arith.addf %7, %8 : vector<64x128xf32>
    %cst_6 = arith.constant 2.000000e+00 : f32
    %10 = vector.broadcast %cst_6 : f32 to vector<64x128xf32>
    %11 = arith.mulf %10, %6 : vector<64x128xf32>
    %12 = arith.subf %9, %11 : vector<64x128xf32>
    %cst_7 = arith.constant 0.000000e+00 : f32
    %13 = vector.broadcast %cst_7 : f32 to vector<64x128xf32>
    %14 = arith.maximumf %12, %13 : vector<64x128xf32>
    %cst_8 = arith.constant 1.000000e+00 : f32
    %15 = vector.broadcast %cst_8 : f32 to vector<64x128xf32>
    %16 = arith.mulf %14, %15 : vector<64x128xf32>
    %cst_9 = arith.constant 1.000000e+00 : f32
    %17 = vector.broadcast %cst_9 : f32 to vector<64x128xf32>
    %18 = arith.addf %17, %16 : vector<64x128xf32>
    %19 = tpu.reciprocal %18 {approx = true} : vector<64x128xf32> -> vector<64x128xf32>
    %cst_10 = arith.constant dense<0.000000e+00> : vector<64xf32>
    %20 = vector.multi_reduction <add>, %19, %cst_10 [1] : vector<64x128xf32> to vector<64xf32>
    %21 = vector.shape_cast %20 : vector<64xf32> to vector<64x1xf32>
    %22 = tpu.reciprocal %21 : vector<64x1xf32> -> vector<64x1xf32>
    %23 = vector.broadcast %22 : vector<64x1xf32> to vector<64x128xf32>
    %24 = arith.mulf %19, %23 : vector<64x128xf32>
    %c0_11 = arith.constant 0 : index
    %c0_12 = arith.constant 0 : index
    %25 = vector.load %arg4[%c0_11, %c0_12] : memref<64x128xf32, #tpu.memory_space<vmem>>, vector<64x128xf32>
    tpu.vector_store %arg4[%c0_11, %c0_12], %24 {strides = array<i32>} : memref<64x128xf32, #tpu.memory_space<vmem>>, vector<64x128xf32>,
    return
  }
  func.func @transform_0(%arg0: i32) -> (i32, i32) {
    %c0_i32 = arith.constant 0 : i32
    %c0_i32_0 = arith.constant 0 : i32
    return %arg0, %c0_i32 : i32, i32
  }
  func.func @transform_1(%arg0: i32) -> (i32, i32) {
    %c0_i32 = arith.constant 0 : i32
    %c0_i32_0 = arith.constant 0 : i32
    %c0_i32_1 = arith.constant 0 : i32
    return %c0_i32, %c0_i32_0 : i32, i32
  }
  func.func @transform_2(%arg0: i32) -> (i32, i32) {
    %c0_i32 = arith.constant 0 : i32
    %c0_i32_0 = arith.constant 0 : i32
    %c0_i32_1 = arith.constant 0 : i32
    return %c0_i32, %c0_i32_0 : i32, i32
  }
  func.func @transform_3(%arg0: i32) -> (i32, i32) {
    %c0_i32 = arith.constant 0 : i32
    %c0_i32_0 = arith.constant 0 : i32
    return %arg0, %c0_i32 : i32, i32
  }
}

module attributes {stable_mosaic.version = 11 : i64} {
  func.func @_dec_kernel(%arg0: i32, %arg1: memref<64x32xf32, #tpu.memory_space<vmem>>, %arg2: memref<32x128xf32, #tpu.memory_space<vmem>>, %arg3: memref<1x128xf32, #tpu.memory_space<vmem>>, %arg4: memref<64x128xf32, #tpu.memory_space<vmem>>) attributes {dimension_semantics = [#tpu.dimension_semantics<parallel>], iteration_bounds = array<i64: 1>, scalar_prefetch = 0 : i64, scratch_operands = 0 : i64, tpu.core_type = #tpu.core_type<tc>, window_params = [{transform_indices = @transform_0, window_bounds = array<i64: 64, 32>}, {pipeline_mode = #tpu.pipeline_mode<synchronous>, transform_indices = @transform_1, window_bounds = array<i64: 32, 128>}, {pipeline_mode = #tpu.pipeline_mode<synchronous>, transform_indices = @transform_2, window_bounds = array<i64: 1, 128>}, {transform_indices = @transform_3, window_bounds = array<i64: 64, 128>}]} {
    %c0 = arith.constant 0 : index
    %c0_0 = arith.constant 0 : index
    %0 = vector.load %arg1[%c0, %c0_0] : memref<64x32xf32, #tpu.memory_space<vmem>>, vector<64x32xf32>
    %c0_1 = arith.constant 0 : index
    %c0_2 = arith.constant 0 : index
    %1 = vector.load %arg2[%c0_1, %c0_2] : memref<32x128xf32, #tpu.memory_space<vmem>>, vector<32x128xf32>
    %c0_3 = arith.constant 0 : index
    %c0_4 = arith.constant 0 : index
    %2 = vector.load %arg3[%c0_3, %c0_4] : memref<1x128xf32, #tpu.memory_space<vmem>>, vector<1x128xf32>
    %3 = arith.mulf %0, %0 : vector<64x32xf32>
    %cst = arith.constant dense<0.000000e+00> : vector<64xf32>
    %4 = vector.multi_reduction <add>, %3, %cst [1] : vector<64x32xf32> to vector<64xf32>
    %5 = vector.shape_cast %4 : vector<64xf32> to vector<64x1xf32>
    %cst_5 = arith.constant dense<0.000000e+00> : vector<64x128xf32>
    %6 = tpu.matmul %0, %1, %cst_5 {dimension_numbers = #tpu.dot_dimension_numbers<[1], [0], [0], [1], [0, 0, 1, 1], [], []>} : vector<64x32xf32>, vector<32x128xf32>, vector<64x128xf32> -> vector<64x128xf32>
    %7 = vector.broadcast %5 : vector<64x1xf32> to vector<64x128xf32>
    %8 = vector.broadcast %2 : vector<1x128xf32> to vector<64x128xf32>
    %9 = arith.addf %7, %8 : vector<64x128xf32>
    %cst_6 = arith.constant 2.000000e+00 : f32
    %10 = vector.broadcast %cst_6 : f32 to vector<64x128xf32>
    %11 = arith.mulf %10, %6 : vector<64x128xf32>
    %12 = arith.subf %9, %11 : vector<64x128xf32>
    %cst_7 = arith.constant 0.000000e+00 : f32
    %13 = vector.broadcast %cst_7 : f32 to vector<64x128xf32>
    %14 = arith.maximumf %12, %13 : vector<64x128xf32>
    %cst_8 = arith.constant 1.000000e+00 : f32
    %15 = vector.broadcast %cst_8 : f32 to vector<64x128xf32>
    %16 = arith.mulf %14, %15 : vector<64x128xf32>
    %cst_9 = arith.constant 1.000000e+00 : f32
    %17 = vector.broadcast %cst_9 : f32 to vector<64x128xf32>
    %18 = arith.addf %17, %16 : vector<64x128xf32>
    %19 = tpu.reciprocal %18 {approx = true} : vector<64x128xf32> -> vector<64x128xf32>
    %cst_10 = arith.constant dense<0.000000e+00> : vector<64xf32>
    %20 = vector.multi_reduction <add>, %19, %cst_10 [1] : vector<64x128xf32> to vector<64xf32>
    %21 = vector.shape_cast %20 : vector<64xf32> to vector<64x1xf32>
    %22 = tpu.reciprocal %21 : vector<64x1xf32> -> vector<64x1xf32>
    %23 = vector.broadcast %22 : vector<64x1xf32> to vector<64x128xf32>
    %24 = arith.mulf %19, %23 : vector<64x128xf32>
    %c0_11 = arith.constant 0 : index
    %c0_12 = arith.constant 0 : index
    %25 = vector.load %arg4[%c0_11, %c0_12] : memref<64x128xf32, #tpu.memory_space<vmem>>, vector<64x128xf32>
    tpu.vector_store %arg4[%c0_11, %c0_12], %24 {strides = array<i32>} : memref<64x128xf32, #tpu.memory_space<vmem>>, vector<64x128xf32>,
    return
  }
  func.func @transform_0(%arg0: i32) -> (i32, i32) {
    %c0_i32 = arith.constant 0 : i32
    %c0_i32_0 = arith.constant 0 : i32
    return %arg0, %c0_i32 : i32, i32
  }
  func.func @transform_1(%arg0: i32) -> (i32, i32) {
    %c0_i32 = arith.constant 0 : i32
    %c0_i32_0 = arith.constant 0 : i32
    %c0_i32_1 = arith.constant 0 : i32
    return %c0_i32, %c0_i32_0 : i32, i32
  }
  func.func @transform_2(%arg0: i32) -> (i32, i32) {
    %c0_i32 = arith.constant 0 : i32
    %c0_i32_0 = arith.constant 0 : i32
    %c0_i32_1 = arith.constant 0 : i32
    return %c0_i32, %c0_i32_0 : i32, i32
  }
  func.func @transform_3(%arg0: i32) -> (i32, i32) {
    %c0_i32 = arith.constant 0 : i32
    %c0_i32_0 = arith.constant 0 : i32
    return %arg0, %c0_i32 : i32, i32
  }
}

</mosaic_0001>

<bundles_post_ra>
// kernel: tpu_custom_call.1
= control target key start
LH: loop header
LB: loop body
LE: loop exit
PB: predicated region body
PF: predicated region fallthrough
CT: control target
= control target key end

     0   :  { %vm36_vm0 = vcmask 261120   ;;  %s602_s0 = inlined_call_operand.vmem [shape: f32[64,32], index: 0, kind: input, shape index: {}]   ;;  %s603_s1 = inlined_call_operand.vmem [shape: f32[32,128], index: 1, kind: input, shape index: {}]   ;;  %s604_s2 = inlined_call_operand.vmem [shape: f32[1,128], index: 2, kind: input, shape index: {}]   ;;  %s605_s3 = inlined_call_operand.hbm [shape: f32[64,128], index: 3, kind: output, shape index: {}]  }
   0x1   :  { %v26_v0 = vld [vmem:[%s603_s1 + $0x18] sm:$0xff]  ;;  %v25_v1 = vld [vmem:[%s603_s1 + $0x10] sm:$0xff]  ;;  %v24_v2 = vld [vmem:[%s603_s1 + $0x8] sm:$0xff] }
   0x2   :  { %97 = vmatpush.msra.mxu0 %v26_v0  ;;  %347 = vmatpush.msra.mxu1 %v26_v0  ;;  %v15_v3 = vld [vmem:[%s602_s0] sm:$0xff]  ;;  %v17_v4 = vld [vmem:[%s602_s0 + $0x10] sm:$0xff] }
   0x3   :  { %348 = vmatpush.msra.mxu2 %v26_v0  ;;  %349 = vmatpush.msra.mxu3 %v26_v0  ;;  %v28_v5 = vmul.f32 %v15_v3, %v15_v3  ;;  %v23_v6 = vld [vmem:[%s603_s1] sm:$0xff]  ;;  %v30_v8 = vmul.f32 %v17_v4, %v17_v4 }
   0x4   :  { %98 = vmatpush.msra.mxu0 %v25_v1  ;;  %350 = vmatpush.msra.mxu1 %v25_v1  ;;  %v19_v7 = vld [vmem:[%s602_s0 + $0x20] sm:$0xff] }
   0x5   :  { %351 = vmatpush.msra.mxu2 %v25_v1  ;;  %352 = vmatpush.msra.mxu3 %v25_v1  ;;  %v32_v9 = vmul.f32 %v19_v7, %v19_v7 }
   0x6   :  { %99 = vmatpush.msra.mxu0 %v24_v2  ;;  %353 = vmatpush.msra.mxu1 %v24_v2 }
   0x7   :  { %8 = vsyncpa [#allocation3], 0  ;;  %354 = vmatpush.msra.mxu2 %v24_v2  ;;  %355 = vmatpush.msra.mxu3 %v24_v2  ;;  %v37_v10 = vsel %vm36_vm0, %v28_v5, 0.0  ;;  %v21_v11 = vld [vmem:[%s602_s0 + $0x30] sm:$0xff]  ;;  %v43_v12 = vsel %vm36_vm0, %v30_v8, 0.0  ;;  %v16_v13 = vld [vmem:[%s602_s0 + $0x8] sm:$0xff] }
   0x8   :  { %100 = vmatpush.msra.mxu0 %v23_v6  ;;  %356 = vmatpush.msra.mxu1 %v23_v6  ;;  %v49_v14 = vsel %vm36_vm0, %v32_v9, 0.0  ;;  %v18_v15 = vld [vmem:[%s602_s0 + $0x18] sm:$0xff]  ;;  %v29_v16 = vmul.f32 %v16_v13, %v16_v13  ;;  %v20_v17 = vld [vmem:[%s602_s0 + $0x28] sm:$0xff]  ;;  %v34_v24 = vmul.f32 %v21_v11, %v21_v11  ;;  %v362_v29 = vld [vmem:[%s604_s2] ss:$0 sm:$0xff]  ;;  %s421_s2 = smov [#allocation2]  }
   0x9   :  { %357 = vmatpush.msra.mxu2 %v23_v6  ;;  %339 = vmatmul.msk.f32.vlgmr.msra.gmra.mxu0 %vm36_vm0, %v15_v3  ;;  %v31_v18 = vmul.f32 %v18_v15, %v18_v15  ;;  %v33_v19 = vmul.f32 %v20_v17, %v20_v17  ;;  %v22_v21 = vld [vmem:[%s602_s0 + $0x38] sm:$0xff]  ;;  %s325_s9 = sshll.u32 %s421_s2, 4  ;;  %s327_s12 = sshll.u32 %s605_s3, 4  ;;  %s326_s9 = int_to_ptr.vmem [resolvable:$true] %s325_s9  ;;  %s328_s12 = int_to_ptr.hbm [resolvable:$true] %s327_s12 }
   0xa   :  { %341 = vmatmul.msk.f32.vlgmr.msra.gmra.mxu1 %vm36_vm0, %v17_v4  ;;  %343 = vmatmul.msk.f32.vlgmr.msra.gmra.mxu2 %vm36_vm0, %v19_v7  ;;  %v40_v20 = vsel %vm36_vm0, %v29_v16, 0.0  ;;  %v35_v25 = vmul.f32 %v22_v21, %v22_v21  ;;  %v55_v26 = vsel %vm36_vm0, %v34_v24, 0.0  ;;  %s422_s13 = smov 128   ;;  %s423_s14 = smov 8  }
   0xb   :  { %358 = vmatpush.msra.mxu3 %v23_v6  ;;  %38 = vadd.xlane.f32.xlu0 %v37_v10  ;;  %v46_v22 = vsel %vm36_vm0, %v31_v18, 0.0  ;;  %v52_v23 = vsel %vm36_vm0, %v33_v19, 0.0 }
   0xc   :  { %345 = vmatmul.msk.f32.vlgmr.msra.gmra.mxu3 %vm36_vm0, %v21_v11  ;;  %44 = vadd.xlane.f32.xlu1 %v43_v12  ;;  %v58_v27 = vsel %vm36_vm0, %v35_v25, 0.0 }
   0xd   :  { %50 = vadd.xlane.f32.xlu2 %v49_v14 }
  0x11   :  { %340 = vmatmul.msk.f32.gmra.mxu0 %vm36_vm0, %v16_v13 }
  0x12   :  { %342 = vmatmul.msk.f32.gmra.mxu1 %vm36_vm0, %v18_v15  ;;  %344 = vmatmul.msk.f32.gmra.mxu2 %vm36_vm0, %v20_v17 }
  0x13   :  { %41 = vadd.xlane.f32.xlu0 %v40_v20 }
  0x14   :  { %346 = vmatmul.msk.f32.gmra.mxu3 %vm36_vm0, %v22_v21  ;;  %47 = vadd.xlane.f32.xlu1 %v46_v22 }
  0x15   :  { %53 = vadd.xlane.f32.xlu2 %v52_v23 }
  0x1b   :  { %56 = vadd.xlane.f32.xlu0 %v55_v26 }
  0x1c   :  { %59 = vadd.xlane.f32.xlu1 %v58_v27 }
  0x7e   :  { %v39_v28 = vpop.xlane.xlu0 %38 }
  0x7f   :  { %v45_v30 = vpop.xlane.xlu1 %44  ;;  %v129_v31 = vadd.f32 %v362_v29, %v39_v28 }
  0x80   :  { %v131_v32 = vadd.f32 %v362_v29, %v45_v30  ;;  %v51_v37 = vpop.xlane.xlu2 %50 }
  0x81   :  { %v133_v44 = vadd.f32 %v362_v29, %v51_v37 }
  0x86   :  { %v102_v33 = vpop.f32.mrf.mxu0  ;;  %v42_v34 = vpop.xlane.xlu0 %41 }
  0x87   :  { %v108_v35 = vpop.f32.mrf.mxu1  ;;  %v137_v36 = vmul.f32 2.0, %v102_v33  ;;  %v48_v42 = vpop.xlane.xlu1 %47  ;;  %v130_v47 = vadd.f32 %v362_v29, %v42_v34 }
  0x88   :  { %v139_v38 = vmul.f32 2.0, %v108_v35  ;;  %v132_v50 = vadd.f32 %v362_v29, %v48_v42  ;;  %v54_v60 = vpop.xlane.xlu2 %53 }
  0x89   :  { %v145_v39 = vsub.f32 %v129_v31, %v137_v36  ;;  %v134_v4 = vadd.f32 %v362_v29, %v54_v60 }
  0x8a   :  { %v147_v40 = vsub.f32 %v131_v32, %v139_v38 }
  0x8b   :  { %v153_v41 = vmax.f32 %v145_v39, 0.0 }
  0x8c   :  { %v155_v43 = vmax.f32 %v147_v40, 0.0 }
  0x8d   :  { %v161_v45 = vadd.f32 1.0, %v153_v41  ;;  %v114_v46 = vpop.f32.mrf.mxu2 }
  0x8e   :  { %v163_v48 = vadd.f32 1.0, %v155_v43  ;;  %v141_v49 = vmul.f32 2.0, %v114_v46  ;;  %v105_v51 = vpop.f32.mrf.mxu0  ;;  %v57_v52 = vpop.xlane.xlu0 %56 }
  0x8f   :  { %363 = vrcp.f32 %v161_v45  ;;  %v111_v53 = vpop.f32.mrf.mxu1  ;;  %v120_v54 = vpop.f32.mrf.mxu3  ;;  %v138_v55 = vmul.f32 2.0, %v105_v51  ;;  %v135_v56 = vadd.f32 %v362_v29, %v57_v52 }
  0x90   :  { %365 = vrcp.f32 %v163_v48  ;;  %v149_v57 = vsub.f32 %v133_v44, %v141_v49  ;;  %v140_v58 = vmul.f32 2.0, %v111_v53  ;;  %v143_v59 = vmul.f32 2.0, %v120_v54  ;;  %v60_v1 = vpop.xlane.xlu1 %59 }
  0x91   :  { %v146_v61 = vsub.f32 %v130_v47, %v138_v55  ;;  %v136_v11 = vadd.f32 %v362_v29, %v60_v1 }
  0x92   :  { %v157_v62 = vmax.f32 %v149_v57, 0.0  ;;  %v148_v63 = vsub.f32 %v132_v50, %v140_v58  ;;  %v151_v0 = vsub.f32 %v135_v56, %v143_v59 }
  0x93   :  { %v154_v5 = vmax.f32 %v146_v61, 0.0 }
  0x94   :  { %v165_v2 = vadd.f32 1.0, %v157_v62  ;;  %v156_v3 = vmax.f32 %v148_v63, 0.0  ;;  %v159_v12 = vmax.f32 %v151_v0, 0.0 }
  0x95   :  { %v499_v6 = vpop.eup %363  ;;  %v117_v7 = vpop.f32.mrf.mxu2  ;;  %v162_v15 = vadd.f32 1.0, %v154_v5 }
  0x96   :  { %v501_v8 = vpop.eup %365  ;;  %367 = vrcp.f32 %v165_v2  ;;  %v164_v9 = vadd.f32 1.0, %v156_v3  ;;  %v142_v10 = vmul.f32 2.0, %v117_v7  ;;  %177 = vadd.xlane.f32.xlu2 %v499_v6  ;;  %v167_v21 = vadd.f32 1.0, %v159_v12 }
  0x97   :  { %181 = vadd.xlane.f32.xlu1 %v501_v8  ;;  %v123_v13 = vpop.f32.mrf.mxu3 }
  0x98   :  { %369 = vrcp.f32 %v164_v9  ;;  %v150_v14 = vsub.f32 %v134_v4, %v142_v10  ;;  %v144_v16 = vmul.f32 2.0, %v123_v13 }
  0x99   :  { %371 = vrcp.f32 %v162_v15 }
  0x9a   :  { %v158_v17 = vmax.f32 %v150_v14, 0.0  ;;  %v152_v18 = vsub.f32 %v136_v11, %v144_v16 }
  0x9c   :  { %v505_v19 = vpop.eup %367  ;;  %v166_v20 = vadd.f32 1.0, %v158_v17  ;;  %v160_v22 = vmax.f32 %v152_v18, 0.0 }
  0x9d   :  { %185 = vadd.xlane.f32.xlu0 %v505_v19 }
  0x9e   :  { %v508_v23 = vpop.eup %369  ;;  %373 = vrcp.f32 %v166_v20  ;;  %v168_v24 = vadd.f32 1.0, %v160_v22 }
  0x9f   :  { %183 = vadd.xlane.f32.xlu2 %v508_v23  ;;  %375 = vrcp.f32 %v167_v21  ;;  %v511_v25 = vpop.eup %371 }
  0xa0   :  { %377 = vrcp.f32 %v168_v24 }
  0xa4   :  { %v513_v26 = vpop.eup %373 }
  0xa5   :  { %187 = vadd.xlane.f32.xlu1 %v513_v26  ;;  %179 = vadd.xlane.f32.xlu0 %v511_v25  ;;  %v517_v27 = vpop.eup %375 }
  0xa6   :  { %v520_v28 = vpop.eup %377 }
  0xa7   :  { %189 = vadd.xlane.f32.xlu2 %v517_v27 }
  0xad   :  { %191 = vadd.xlane.f32.xlu0 %v520_v28 }
 0x109   :  { %v178_v29 = vpop.xlane.xlu2 %177 }
 0x10a   :  { %v182_v30 = vpop.xlane.xlu1 %181  ;;  %379 = vrcp.f32 %v178_v29  ;;  %v202_v38 = vand.u32 2147483647, %v178_v29  ;;  %v204_v41 = vand.u32 2147483648, %v178_v29  ;;  %vm198_vm1 = vweird.f32 %v178_v29 }
 0x10b   :  { %381 = vrcp.f32 %v182_v30  ;;  %v230_v40 = vand.u32 2147483647, %v182_v30  ;;  %v232_v42 = vand.u32 2147483648, %v182_v30  ;;  %vm226_vm3 = vweird.f32 %v182_v30 }
 0x10c   :  { %vm203_vm5 = vcmp.eq.f32.partialorder %v202_v38, 8.507059e+37  ;;  %v205_v49 = vor.u32 1.1754944e-38, %v204_v41 }
 0x10d   :  { %vm529_vm6 = vcmp.eq.f32.partialorder %v230_v40, 8.507059e+37  ;;  %v233_v54 = vor.u32 1.1754944e-38, %v232_v42 }
 0x110   :  { %v380_v31 = vpop.eup %379  ;;  %v523_v32 = vpop.xlane.xlu0 %185 }
 0x111   :  { %v382_v33 = vpop.eup %381  ;;  %v194_v34 = vmul.f32 %v380_v31, %v178_v29  ;;  %383 = vrcp.f32 %v523_v32  ;;  %vm199_vm2 = vweird.f32 %v380_v31  ;;  %vm254_vm9 = vweird.f32 %v523_v32 }
 0x112   :  { %v222_v35 = vmul.f32 %v382_v33, %v182_v30  ;;  %v526_v36 = vpop.xlane.xlu2 %183  ;;  %vm227_vm4 = vweird.f32 %v382_v33  ;;  %vm200_vm7 = vmor %vm198_vm1, %vm199_vm2  ;;  %v258_v62 = vand.u32 2147483647, %v523_v32  ;;  %v260_v63 = vand.u32 2147483648, %v523_v32 }
 0x113   :  { %v195_v37 = vsub.f32 1.0, %v194_v34  ;;  %385 = vrcp.f32 %v526_v36  ;;  %vm228_vm8 = vmor %vm226_vm3, %vm227_vm4  ;;  %vm240_vm11 = vweird.f32 %v526_v36  ;;  %v244_v4 = vand.u32 2147483647, %v526_v36 }
 0x114   :  { %v223_v39 = vsub.f32 1.0, %v222_v35  ;;  %v246_v5 = vand.u32 2147483648, %v526_v36  ;;  %vm259_vm14 = vcmp.eq.f32.partialorder %v258_v62, 8.507059e+37 }
 0x115   :  { %v196_v43 = vmul.f32 %v380_v31, %v195_v37  ;;  %vm245_vm0 = vcmp.eq.f32.partialorder %v244_v4, 8.507059e+37 }
 0x116   :  { %v224_v44 = vmul.f32 %v382_v33, %v223_v39  ;;  %v247_v15 = vor.u32 1.1754944e-38, %v246_v5 }
 0x117   :  { %v384_v45 = vpop.eup %383  ;;  %v197_v46 = vadd.f32 %v380_v31, %v196_v43 }
 0x118   :  { %v225_v47 = vadd.f32 %v382_v33, %v224_v44  ;;  %v250_v50 = vmul.f32 %v384_v45, %v523_v32  ;;  %v534_v51 = vpop.xlane.xlu1 %187  ;;  %v536_v52 = vpop.xlane.xlu0 %179  ;;  %vm255_vm10 = vweird.f32 %v384_v45 }
 0x119   :  { %v386_v53 = vpop.eup %385  ;;  %v201_v55 = vsel %vm200_vm7, %v380_v31, %v197_v46  ;;  %387 = vrcp.f32 %v534_v51  ;;  %vm256_vm13 = vmor %vm254_vm9, %vm255_vm10  ;;  %v272_v16 = vand.u32 2147483647, %v534_v51  ;;  %vm268_vm1 = vweird.f32 %v534_v51 }
 0x11a   :  { %v229_v56 = vsel %vm228_vm8, %v382_v33, %v225_v47  ;;  %v206_v57 = vsel %vm203_vm5, %v205_v49, %v201_v55  ;;  %v251_v58 = vsub.f32 1.0, %v250_v50  ;;  %v236_v59 = vmul.f32 %v386_v53, %v526_v36  ;;  %v546_v0 = vpop.xlane.xlu2 %189 }
 0x11b   :  { %v234_v60 = vsel %vm529_vm6, %v233_v54, %v229_v56  ;;  %v305_v61 = vmul.f32 %v499_v6, %v206_v57  ;;  %389 = vrcp.f32 %v536_v52  ;;  %vm241_vm12 = vweird.f32 %v386_v53 }
 0x11c   :  { %v307_v1 = vmul.f32 %v501_v8, %v234_v60  ;;  %v252_v2 = vmul.f32 %v384_v45, %v251_v58  ;;  %v237_v3 = vsub.f32 1.0, %v236_v59  ;;  %391 = vrcp.f32 %v546_v0  ;;  %vm242_vm15 = vmor %vm240_vm11, %vm241_vm12 }
 0x11d   :  { %313 = vst [vmem:[#allocation2] sm:$0xff] %v305_v61  ;;  %v261_v8 = vor.u32 1.1754944e-38, %v260_v63  ;;  %v274_v24 = vand.u32 2147483648, %v534_v51  ;;  %v216_v29 = vand.u32 2147483647, %v536_v52  ;;  %vm569_vm3 = vcmp.eq.f32.partialorder %v272_v16, 8.507059e+37 }
 0x11e   :  { %315 = vst [vmem:[#allocation2 + $0x10] sm:$0xff] %v307_v1  ;;  %v253_v6 = vadd.f32 %v384_v45, %v252_v2  ;;  %v238_v7 = vmul.f32 %v386_v53, %v237_v3  ;;  %vm212_vm4 = vweird.f32 %v536_v52  ;;  %v218_v37 = vand.u32 2147483648, %v536_v52 }
 0x11f   :  { %v388_v9 = vpop.eup %387  ;;  %vm578_vm6 = vcmp.eq.f32.partialorder %v216_v29, 8.507059e+37  ;;  %v288_v41 = vand.u32 2147483648, %v546_v0  ;;  %v286_v47 = vand.u32 2147483647, %v546_v0  ;;  %vm282_vm10 = vweird.f32 %v546_v0 }
 0x120   :  { %v257_v10 = vsel %vm256_vm13, %v384_v45, %v253_v6  ;;  %v239_v11 = vadd.f32 %v386_v53, %v238_v7  ;;  %v264_v12 = vmul.f32 %v388_v9, %v534_v51  ;;  %v557_v13 = vpop.xlane.xlu0 %191  ;;  %vm269_vm2 = vweird.f32 %v388_v9 }
 0x121   :  { %v262_v14 = vsel %vm259_vm14, %v261_v8, %v257_v10  ;;  %393 = vrcp.f32 %v557_v13  ;;  %v390_v21 = vpop.eup %389  ;;  %vm270_vm5 = vmor %vm268_vm1, %vm269_vm2  ;;  %v219_v50 = vor.u32 1.1754944e-38, %v218_v37  ;;  %v289_v54 = vor.u32 1.1754944e-38, %v288_v41 }
 0x122   :  { %v309_v17 = vmul.f32 %v505_v19, %v262_v14  ;;  %v243_v18 = vsel %vm242_vm15, %v386_v53, %v239_v11  ;;  %v265_v20 = vsub.f32 1.0, %v264_v12  ;;  %v392_v30 = vpop.eup %391  ;;  %v208_v33 = vmul.f32 %v390_v21, %v536_v52 }
 0x123   :  { %v248_v22 = vsel %vm245_vm0, %v247_v15, %v243_v18  ;;  %v278_v34 = vmul.f32 %v392_v30, %v546_v0  ;;  %vm213_vm7 = vweird.f32 %v390_v21  ;;  %vm283_vm8 = vweird.f32 %v392_v30 }
 0x124   :  { %317 = vst [vmem:[#allocation2 + $0x20] sm:$0xff] %v309_v17  ;;  %v308_v31 = vmul.f32 %v508_v23, %v248_v22  ;;  %v266_v32 = vmul.f32 %v388_v9, %v265_v20  ;;  %v209_v36 = vsub.f32 1.0, %v208_v33  ;;  %v275_v23 = vor.u32 1.1754944e-38, %v274_v24  ;;  %vm214_vm9 = vmor %vm212_vm4, %vm213_vm7 }
 0x125   :  { %v279_v40 = vsub.f32 1.0, %v278_v34  ;;  %v302_v55 = vand.u32 2147483648, %v557_v13  ;;  %vm284_vm11 = vmor %vm282_vm10, %vm283_vm8  ;;  %v300_v58 = vand.u32 2147483647, %v557_v13  ;;  %vm287_vm13 = vcmp.eq.f32.partialorder %v286_v47, 8.507059e+37 }
 0x126   :  { %316 = vst [vmem:[#allocation2 + $0x18] sm:$0xff] %v308_v31  ;;  %v267_v35 = vadd.f32 %v388_v9, %v266_v32  ;;  %v210_v43 = vmul.f32 %v390_v21, %v209_v36  ;;  %vm296_vm14 = vweird.f32 %v557_v13 }
 0x127   :  { %v394_v38 = vpop.eup %393  ;;  %v280_v46 = vmul.f32 %v392_v30, %v279_v40  ;;  %v303_v63 = vor.u32 1.1754944e-38, %v302_v55  ;;  %vm301_vm0 = vcmp.eq.f32.partialorder %v300_v58, 8.507059e+37 }
 0x128   :  { %v271_v42 = vsel %vm270_vm5, %v388_v9, %v267_v35  ;;  %v292_v44 = vmul.f32 %v394_v38, %v557_v13  ;;  %v211_v49 = vadd.f32 %v390_v21, %v210_v43  ;;  %vm297_vm12 = vweird.f32 %v394_v38 }
 0x129   :  { %v276_v45 = vsel %vm569_vm3, %v275_v23, %v271_v42  ;;  %v281_v53 = vadd.f32 %v392_v30, %v280_v46  ;;  %vm298_vm15 = vmor %vm296_vm14, %vm297_vm12 }
 0x12a   :  { %v310_v48 = vmul.f32 %v513_v26, %v276_v45  ;;  %v293_v51 = vsub.f32 1.0, %v292_v44  ;;  %v215_v56 = vsel %vm214_vm9, %v390_v21, %v211_v49 }
 0x12b   :  { %v220_v26 = vsel %vm578_vm6, %v219_v50, %v215_v56  ;;  %v285_v59 = vsel %vm284_vm11, %v392_v30, %v281_v53 }
 0x12c   :  { %318 = vst [vmem:[#allocation2 + $0x28] sm:$0xff] %v310_v48  ;;  %v294_v57 = vmul.f32 %v394_v38, %v293_v51  ;;  %v306_v52 = vmul.f32 %v511_v25, %v220_v26  ;;  %v290_v60 = vsel %vm287_vm13, %v289_v54, %v285_v59 }
 0x12d   :  { %v311_v62 = vmul.f32 %v517_v27, %v290_v60 }
 0x12e   :  { %v295_v61 = vadd.f32 %v394_v38, %v294_v57  ;;  %314 = vst [vmem:[#allocation2 + $0x8] sm:$0xff] %v306_v52 }
 0x12f   :  { %319 = vst [vmem:[#allocation2 + $0x30] sm:$0xff] %v311_v62 }
 0x130   :  { %v299_v0 = vsel %vm298_vm15, %v394_v38, %v295_v61 }
 0x131   :  { %v304_v1 = vsel %vm301_vm0, %v303_v63, %v299_v0 }
 0x132   :  { %v312_v25 = vmul.f32 %v520_v28, %v304_v1 }
 0x134   :  { %320 = vst [vmem:[#allocation2 + $0x38] sm:$0xff] %v312_v25 }
 0x135   :  { %333 = dma.vmem_to_hbm [thread:$0]  %s326_s9, 1024, %s328_s12, [#allocation3], %s422_s13, %s422_s13, %s423_s14  }
 0x136   :  { %419 = dma.done.wait [#allocation3], 1024  }
 0x137   :  { %420 = vsyncadd [#allocation3], 4294966272 }
 0x138   :  { %338 = vsyncpa [#allocation3], 1 }

// kernel: tpu_custom_call.1
= control target key start
LH: loop header
LB: loop body
LE: loop exit
PB: predicated region body
PF: predicated region fallthrough
CT: control target
= control target key end

     0   :  { %vm36_vm0 = vcmask 261120   ;;  %s602_s0 = inlined_call_operand.vmem [shape: f32[64,32], index: 0, kind: input, shape index: {}]   ;;  %s603_s1 = inlined_call_operand.vmem [shape: f32[32,128], index: 1, kind: input, shape index: {}]   ;;  %s604_s2 = inlined_call_operand.vmem [shape: f32[1,128], index: 2, kind: input, shape index: {}]   ;;  %s605_s3 = inlined_call_operand.hbm [shape: f32[64,128], index: 3, kind: output, shape index: {}]  }
   0x1   :  { %v26_v0 = vld [vmem:[%s603_s1 + $0x18] sm:$0xff]  ;;  %v25_v1 = vld [vmem:[%s603_s1 + $0x10] sm:$0xff]  ;;  %v24_v2 = vld [vmem:[%s603_s1 + $0x8] sm:$0xff] }
   0x2   :  { %97 = vmatpush.msra.mxu0 %v26_v0  ;;  %347 = vmatpush.msra.mxu1 %v26_v0  ;;  %v15_v3 = vld [vmem:[%s602_s0] sm:$0xff]  ;;  %v17_v4 = vld [vmem:[%s602_s0 + $0x10] sm:$0xff] }
   0x3   :  { %348 = vmatpush.msra.mxu2 %v26_v0  ;;  %349 = vmatpush.msra.mxu3 %v26_v0  ;;  %v28_v5 = vmul.f32 %v15_v3, %v15_v3  ;;  %v23_v6 = vld [vmem:[%s603_s1] sm:$0xff]  ;;  %v30_v8 = vmul.f32 %v17_v4, %v17_v4 }
   0x4   :  { %98 = vmatpush.msra.mxu0 %v25_v1  ;;  %350 = vmatpush.msra.mxu1 %v25_v1  ;;  %v19_v7 = vld [vmem:[%s602_s0 + $0x20] sm:$0xff] }
   0x5   :  { %351 = vmatpush.msra.mxu2 %v25_v1  ;;  %352 = vmatpush.msra.mxu3 %v25_v1  ;;  %v32_v9 = vmul.f32 %v19_v7, %v19_v7 }
   0x6   :  { %99 = vmatpush.msra.mxu0 %v24_v2  ;;  %353 = vmatpush.msra.mxu1 %v24_v2 }
   0x7   :  { %8 = vsyncpa [#allocation3], 0  ;;  %354 = vmatpush.msra.mxu2 %v24_v2  ;;  %355 = vmatpush.msra.mxu3 %v24_v2  ;;  %v37_v10 = vsel %vm36_vm0, %v28_v5, 0.0  ;;  %v21_v11 = vld [vmem:[%s602_s0 + $0x30] sm:$0xff]  ;;  %v43_v12 = vsel %vm36_vm0, %v30_v8, 0.0  ;;  %v16_v13 = vld [vmem:[%s602_s0 + $0x8] sm:$0xff] }
   0x8   :  { %100 = vmatpush.msra.mxu0 %v23_v6  ;;  %356 = vmatpush.msra.mxu1 %v23_v6  ;;  %v49_v14 = vsel %vm36_vm0, %v32_v9, 0.0  ;;  %v18_v15 = vld [vmem:[%s602_s0 + $0x18] sm:$0xff]  ;;  %v29_v16 = vmul.f32 %v16_v13, %v16_v13  ;;  %v20_v17 = vld [vmem:[%s602_s0 + $0x28] sm:$0xff]  ;;  %v34_v24 = vmul.f32 %v21_v11, %v21_v11  ;;  %v362_v29 = vld [vmem:[%s604_s2] ss:$0 sm:$0xff]  ;;  %s421_s2 = smov [#allocation2]  }
   0x9   :  { %357 = vmatpush.msra.mxu2 %v23_v6  ;;  %339 = vmatmul.msk.f32.vlgmr.msra.gmra.mxu0 %vm36_vm0, %v15_v3  ;;  %v31_v18 = vmul.f32 %v18_v15, %v18_v15  ;;  %v33_v19 = vmul.f32 %v20_v17, %v20_v17  ;;  %v22_v21 = vld [vmem:[%s602_s0 + $0x38] sm:$0xff]  ;;  %s325_s9 = sshll.u32 %s421_s2, 4  ;;  %s327_s12 = sshll.u32 %s605_s3, 4  ;;  %s326_s9 = int_to_ptr.vmem [resolvable:$true] %s325_s9  ;;  %s328_s12 = int_to_ptr.hbm [resolvable:$true] %s327_s12 }
   0xa   :  { %341 = vmatmul.msk.f32.vlgmr.msra.gmra.mxu1 %vm36_vm0, %v17_v4  ;;  %343 = vmatmul.msk.f32.vlgmr.msra.gmra.mxu2 %vm36_vm0, %v19_v7  ;;  %v40_v20 = vsel %vm36_vm0, %v29_v16, 0.0  ;;  %v35_v25 = vmul.f32 %v22_v21, %v22_v21  ;;  %v55_v26 = vsel %vm36_vm0, %v34_v24, 0.0  ;;  %s422_s13 = smov 128   ;;  %s423_s14 = smov 8  }
   0xb   :  { %358 = vmatpush.msra.mxu3 %v23_v6  ;;  %38 = vadd.xlane.f32.xlu0 %v37_v10  ;;  %v46_v22 = vsel %vm36_vm0, %v31_v18, 0.0  ;;  %v52_v23 = vsel %vm36_vm0, %v33_v19, 0.0 }
   0xc   :  { %345 = vmatmul.msk.f32.vlgmr.msra.gmra.mxu3 %vm36_vm0, %v21_v11  ;;  %44 = vadd.xlane.f32.xlu1 %v43_v12  ;;  %v58_v27 = vsel %vm36_vm0, %v35_v25, 0.0 }
   0xd   :  { %50 = vadd.xlane.f32.xlu2 %v49_v14 }
  0x11   :  { %340 = vmatmul.msk.f32.gmra.mxu0 %vm36_vm0, %v16_v13 }
  0x12   :  { %342 = vmatmul.msk.f32.gmra.mxu1 %vm36_vm0, %v18_v15  ;;  %344 = vmatmul.msk.f32.gmra.mxu2 %vm36_vm0, %v20_v17 }
  0x13   :  { %41 = vadd.xlane.f32.xlu0 %v40_v20 }
  0x14   :  { %346 = vmatmul.msk.f32.gmra.mxu3 %vm36_vm0, %v22_v21  ;;  %47 = vadd.xlane.f32.xlu1 %v46_v22 }
  0x15   :  { %53 = vadd.xlane.f32.xlu2 %v52_v23 }
  0x1b   :  { %56 = vadd.xlane.f32.xlu0 %v55_v26 }
  0x1c   :  { %59 = vadd.xlane.f32.xlu1 %v58_v27 }
  0x7e   :  { %v39_v28 = vpop.xlane.xlu0 %38 }
  0x7f   :  { %v45_v30 = vpop.xlane.xlu1 %44  ;;  %v129_v31 = vadd.f32 %v362_v29, %v39_v28 }
  0x80   :  { %v131_v32 = vadd.f32 %v362_v29, %v45_v30  ;;  %v51_v37 = vpop.xlane.xlu2 %50 }
  0x81   :  { %v133_v44 = vadd.f32 %v362_v29, %v51_v37 }
  0x86   :  { %v102_v33 = vpop.f32.mrf.mxu0  ;;  %v42_v34 = vpop.xlane.xlu0 %41 }
  0x87   :  { %v108_v35 = vpop.f32.mrf.mxu1  ;;  %v137_v36 = vmul.f32 2.0, %v102_v33  ;;  %v48_v42 = vpop.xlane.xlu1 %47  ;;  %v130_v47 = vadd.f32 %v362_v29, %v42_v34 }
  0x88   :  { %v139_v38 = vmul.f32 2.0, %v108_v35  ;;  %v132_v50 = vadd.f32 %v362_v29, %v48_v42  ;;  %v54_v60 = vpop.xlane.xlu2 %53 }
  0x89   :  { %v145_v39 = vsub.f32 %v129_v31, %v137_v36  ;;  %v134_v4 = vadd.f32 %v362_v29, %v54_v60 }
  0x8a   :  { %v147_v40 = vsub.f32 %v131_v32, %v139_v38 }
  0x8b   :  { %v153_v41 = vmax.f32 %v145_v39, 0.0 }
  0x8c   :  { %v155_v43 = vmax.f32 %v147_v40, 0.0 }
  0x8d   :  { %v161_v45 = vadd.f32 1.0, %v153_v41  ;;  %v114_v46 = vpop.f32.mrf.mxu2 }
  0x8e   :  { %v163_v48 = vadd.f32 1.0, %v155_v43  ;;  %v141_v49 = vmul.f32 2.0, %v114_v46  ;;  %v105_v51 = vpop.f32.mrf.mxu0  ;;  %v57_v52 = vpop.xlane.xlu0 %56 }
  0x8f   :  { %363 = vrcp.f32 %v161_v45  ;;  %v111_v53 = vpop.f32.mrf.mxu1  ;;  %v120_v54 = vpop.f32.mrf.mxu3  ;;  %v138_v55 = vmul.f32 2.0, %v105_v51  ;;  %v135_v56 = vadd.f32 %v362_v29, %v57_v52 }
  0x90   :  { %365 = vrcp.f32 %v163_v48  ;;  %v149_v57 = vsub.f32 %v133_v44, %v141_v49  ;;  %v140_v58 = vmul.f32 2.0, %v111_v53  ;;  %v143_v59 = vmul.f32 2.0, %v120_v54  ;;  %v60_v1 = vpop.xlane.xlu1 %59 }
  0x91   :  { %v146_v61 = vsub.f32 %v130_v47, %v138_v55  ;;  %v136_v11 = vadd.f32 %v362_v29, %v60_v1 }
  0x92   :  { %v157_v62 = vmax.f32 %v149_v57, 0.0  ;;  %v148_v63 = vsub.f32 %v132_v50, %v140_v58  ;;  %v151_v0 = vsub.f32 %v135_v56, %v143_v59 }
  0x93   :  { %v154_v5 = vmax.f32 %v146_v61, 0.0 }
  0x94   :  { %v165_v2 = vadd.f32 1.0, %v157_v62  ;;  %v156_v3 = vmax.f32 %v148_v63, 0.0  ;;  %v159_v12 = vmax.f32 %v151_v0, 0.0 }
  0x95   :  { %v499_v6 = vpop.eup %363  ;;  %v117_v7 = vpop.f32.mrf.mxu2  ;;  %v162_v15 = vadd.f32 1.0, %v154_v5 }
  0x96   :  { %v501_v8 = vpop.eup %365  ;;  %367 = vrcp.f32 %v165_v2  ;;  %v164_v9 = vadd.f32 1.0, %v156_v3  ;;  %v142_v10 = vmul.f32 2.0, %v117_v7  ;;  %177 = vadd.xlane.f32.xlu2 %v499_v6  ;;  %v167_v21 = vadd.f32 1.0, %v159_v12 }
  0x97   :  { %181 = vadd.xlane.f32.xlu1 %v501_v8  ;;  %v123_v13 = vpop.f32.mrf.mxu3 }
  0x98   :  { %369 = vrcp.f32 %v164_v9  ;;  %v150_v14 = vsub.f32 %v134_v4, %v142_v10  ;;  %v144_v16 = vmul.f32 2.0, %v123_v13 }
  0x99   :  { %371 = vrcp.f32 %v162_v15 }
  0x9a   :  { %v158_v17 = vmax.f32 %v150_v14, 0.0  ;;  %v152_v18 = vsub.f32 %v136_v11, %v144_v16 }
  0x9c   :  { %v505_v19 = vpop.eup %367  ;;  %v166_v20 = vadd.f32 1.0, %v158_v17  ;;  %v160_v22 = vmax.f32 %v152_v18, 0.0 }
  0x9d   :  { %185 = vadd.xlane.f32.xlu0 %v505_v19 }
  0x9e   :  { %v508_v23 = vpop.eup %369  ;;  %373 = vrcp.f32 %v166_v20  ;;  %v168_v24 = vadd.f32 1.0, %v160_v22 }
  0x9f   :  { %183 = vadd.xlane.f32.xlu2 %v508_v23  ;;  %375 = vrcp.f32 %v167_v21  ;;  %v511_v25 = vpop.eup %371 }
  0xa0   :  { %377 = vrcp.f32 %v168_v24 }
  0xa4   :  { %v513_v26 = vpop.eup %373 }
  0xa5   :  { %187 = vadd.xlane.f32.xlu1 %v513_v26  ;;  %179 = vadd.xlane.f32.xlu0 %v511_v25  ;;  %v517_v27 = vpop.eup %375 }
  0xa6   :  { %v520_v28 = vpop.eup %377 }
  0xa7   :  { %189 = vadd.xlane.f32.xlu2 %v517_v27 }
  0xad   :  { %191 = vadd.xlane.f32.xlu0 %v520_v28 }
 0x109   :  { %v178_v29 = vpop.xlane.xlu2 %177 }
 0x10a   :  { %v182_v30 = vpop.xlane.xlu1 %181  ;;  %379 = vrcp.f32 %v178_v29  ;;  %v202_v38 = vand.u32 2147483647, %v178_v29  ;;  %v204_v41 = vand.u32 2147483648, %v178_v29  ;;  %vm198_vm1 = vweird.f32 %v178_v29 }
 0x10b   :  { %381 = vrcp.f32 %v182_v30  ;;  %v230_v40 = vand.u32 2147483647, %v182_v30  ;;  %v232_v42 = vand.u32 2147483648, %v182_v30  ;;  %vm226_vm3 = vweird.f32 %v182_v30 }
 0x10c   :  { %vm203_vm5 = vcmp.eq.f32.partialorder %v202_v38, 8.507059e+37  ;;  %v205_v49 = vor.u32 1.1754944e-38, %v204_v41 }
 0x10d   :  { %vm529_vm6 = vcmp.eq.f32.partialorder %v230_v40, 8.507059e+37  ;;  %v233_v54 = vor.u32 1.1754944e-38, %v232_v42 }
 0x110   :  { %v380_v31 = vpop.eup %379  ;;  %v523_v32 = vpop.xlane.xlu0 %185 }
 0x111   :  { %v382_v33 = vpop.eup %381  ;;  %v194_v34 = vmul.f32 %v380_v31, %v178_v29  ;;  %383 = vrcp.f32 %v523_v32  ;;  %vm199_vm2 = vweird.f32 %v380_v31  ;;  %vm254_vm9 = vweird.f32 %v523_v32 }
 0x112   :  { %v222_v35 = vmul.f32 %v382_v33, %v182_v30  ;;  %v526_v36 = vpop.xlane.xlu2 %183  ;;  %vm227_vm4 = vweird.f32 %v382_v33  ;;  %vm200_vm7 = vmor %vm198_vm1, %vm199_vm2  ;;  %v258_v62 = vand.u32 2147483647, %v523_v32  ;;  %v260_v63 = vand.u32 2147483648, %v523_v32 }
 0x113   :  { %v195_v37 = vsub.f32 1.0, %v194_v34  ;;  %385 = vrcp.f32 %v526_v36  ;;  %vm228_vm8 = vmor %vm226_vm3, %vm227_vm4  ;;  %vm240_vm11 = vweird.f32 %v526_v36  ;;  %v244_v4 = vand.u32 2147483647, %v526_v36 }
 0x114   :  { %v223_v39 = vsub.f32 1.0, %v222_v35  ;;  %v246_v5 = vand.u32 2147483648, %v526_v36  ;;  %vm259_vm14 = vcmp.eq.f32.partialorder %v258_v62, 8.507059e+37 }
 0x115   :  { %v196_v43 = vmul.f32 %v380_v31, %v195_v37  ;;  %vm245_vm0 = vcmp.eq.f32.partialorder %v244_v4, 8.507059e+37 }
 0x116   :  { %v224_v44 = vmul.f32 %v382_v33, %v223_v39  ;;  %v247_v15 = vor.u32 1.1754944e-38, %v246_v5 }
 0x117   :  { %v384_v45 = vpop.eup %383  ;;  %v197_v46 = vadd.f32 %v380_v31, %v196_v43 }
 0x118   :  { %v225_v47 = vadd.f32 %v382_v33, %v224_v44  ;;  %v250_v50 = vmul.f32 %v384_v45, %v523_v32  ;;  %v534_v51 = vpop.xlane.xlu1 %187  ;;  %v536_v52 = vpop.xlane.xlu0 %179  ;;  %vm255_vm10 = vweird.f32 %v384_v45 }
 0x119   :  { %v386_v53 = vpop.eup %385  ;;  %v201_v55 = vsel %vm200_vm7, %v380_v31, %v197_v46  ;;  %387 = vrcp.f32 %v534_v51  ;;  %vm256_vm13 = vmor %vm254_vm9, %vm255_vm10  ;;  %v272_v16 = vand.u32 2147483647, %v534_v51  ;;  %vm268_vm1 = vweird.f32 %v534_v51 }
 0x11a   :  { %v229_v56 = vsel %vm228_vm8, %v382_v33, %v225_v47  ;;  %v206_v57 = vsel %vm203_vm5, %v205_v49, %v201_v55  ;;  %v251_v58 = vsub.f32 1.0, %v250_v50  ;;  %v236_v59 = vmul.f32 %v386_v53, %v526_v36  ;;  %v546_v0 = vpop.xlane.xlu2 %189 }
 0x11b   :  { %v234_v60 = vsel %vm529_vm6, %v233_v54, %v229_v56  ;;  %v305_v61 = vmul.f32 %v499_v6, %v206_v57  ;;  %389 = vrcp.f32 %v536_v52  ;;  %vm241_vm12 = vweird.f32 %v386_v53 }
 0x11c   :  { %v307_v1 = vmul.f32 %v501_v8, %v234_v60  ;;  %v252_v2 = vmul.f32 %v384_v45, %v251_v58  ;;  %v237_v3 = vsub.f32 1.0, %v236_v59  ;;  %391 = vrcp.f32 %v546_v0  ;;  %vm242_vm15 = vmor %vm240_vm11, %vm241_vm12 }
 0x11d   :  { %313 = vst [vmem:[#allocation2] sm:$0xff] %v305_v61  ;;  %v261_v8 = vor.u32 1.1754944e-38, %v260_v63  ;;  %v274_v24 = vand.u32 2147483648, %v534_v51  ;;  %v216_v29 = vand.u32 2147483647, %v536_v52  ;;  %vm569_vm3 = vcmp.eq.f32.partialorder %v272_v16, 8.507059e+37 }
 0x11e   :  { %315 = vst [vmem:[#allocation2 + $0x10] sm:$0xff] %v307_v1  ;;  %v253_v6 = vadd.f32 %v384_v45, %v252_v2  ;;  %v238_v7 = vmul.f32 %v386_v53, %v237_v3  ;;  %vm212_vm4 = vweird.f32 %v536_v52  ;;  %v218_v37 = vand.u32 2147483648, %v536_v52 }
 0x11f   :  { %v388_v9 = vpop.eup %387  ;;  %vm578_vm6 = vcmp.eq.f32.partialorder %v216_v29, 8.507059e+37  ;;  %v288_v41 = vand.u32 2147483648, %v546_v0  ;;  %v286_v47 = vand.u32 2147483647, %v546_v0  ;;  %vm282_vm10 = vweird.f32 %v546_v0 }
 0x120   :  { %v257_v10 = vsel %vm256_vm13, %v384_v45, %v253_v6  ;;  %v239_v11 = vadd.f32 %v386_v53, %v238_v7  ;;  %v264_v12 = vmul.f32 %v388_v9, %v534_v51  ;;  %v557_v13 = vpop.xlane.xlu0 %191  ;;  %vm269_vm2 = vweird.f32 %v388_v9 }
 0x121   :  { %v262_v14 = vsel %vm259_vm14, %v261_v8, %v257_v10  ;;  %393 = vrcp.f32 %v557_v13  ;;  %v390_v21 = vpop.eup %389  ;;  %vm270_vm5 = vmor %vm268_vm1, %vm269_vm2  ;;  %v219_v50 = vor.u32 1.1754944e-38, %v218_v37  ;;  %v289_v54 = vor.u32 1.1754944e-38, %v288_v41 }
 0x122   :  { %v309_v17 = vmul.f32 %v505_v19, %v262_v14  ;;  %v243_v18 = vsel %vm242_vm15, %v386_v53, %v239_v11  ;;  %v265_v20 = vsub.f32 1.0, %v264_v12  ;;  %v392_v30 = vpop.eup %391  ;;  %v208_v33 = vmul.f32 %v390_v21, %v536_v52 }
 0x123   :  { %v248_v22 = vsel %vm245_vm0, %v247_v15, %v243_v18  ;;  %v278_v34 = vmul.f32 %v392_v30, %v546_v0  ;;  %vm213_vm7 = vweird.f32 %v390_v21  ;;  %vm283_vm8 = vweird.f32 %v392_v30 }
 0x124   :  { %317 = vst [vmem:[#allocation2 + $0x20] sm:$0xff] %v309_v17  ;;  %v308_v31 = vmul.f32 %v508_v23, %v248_v22  ;;  %v266_v32 = vmul.f32 %v388_v9, %v265_v20  ;;  %v209_v36 = vsub.f32 1.0, %v208_v33  ;;  %v275_v23 = vor.u32 1.1754944e-38, %v274_v24  ;;  %vm214_vm9 = vmor %vm212_vm4, %vm213_vm7 }
 0x125   :  { %v279_v40 = vsub.f32 1.0, %v278_v34  ;;  %v302_v55 = vand.u32 2147483648, %v557_v13  ;;  %vm284_vm11 = vmor %vm282_vm10, %vm283_vm8  ;;  %v300_v58 = vand.u32 2147483647, %v557_v13  ;;  %vm287_vm13 = vcmp.eq.f32.partialorder %v286_v47, 8.507059e+37 }
 0x126   :  { %316 = vst [vmem:[#allocation2 + $0x18] sm:$0xff] %v308_v31  ;;  %v267_v35 = vadd.f32 %v388_v9, %v266_v32  ;;  %v210_v43 = vmul.f32 %v390_v21, %v209_v36  ;;  %vm296_vm14 = vweird.f32 %v557_v13 }
 0x127   :  { %v394_v38 = vpop.eup %393  ;;  %v280_v46 = vmul.f32 %v392_v30, %v279_v40  ;;  %v303_v63 = vor.u32 1.1754944e-38, %v302_v55  ;;  %vm301_vm0 = vcmp.eq.f32.partialorder %v300_v58, 8.507059e+37 }
 0x128   :  { %v271_v42 = vsel %vm270_vm5, %v388_v9, %v267_v35  ;;  %v292_v44 = vmul.f32 %v394_v38, %v557_v13  ;;  %v211_v49 = vadd.f32 %v390_v21, %v210_v43  ;;  %vm297_vm12 = vweird.f32 %v394_v38 }
 0x129   :  { %v276_v45 = vsel %vm569_vm3, %v275_v23, %v271_v42  ;;  %v281_v53 = vadd.f32 %v392_v30, %v280_v46  ;;  %vm298_vm15 = vmor %vm296_vm14, %vm297_vm12 }
 0x12a   :  { %v310_v48 = vmul.f32 %v513_v26, %v276_v45  ;;  %v293_v51 = vsub.f32 1.0, %v292_v44  ;;  %v215_v56 = vsel %vm214_vm9, %v390_v21, %v211_v49 }
 0x12b   :  { %v220_v26 = vsel %vm578_vm6, %v219_v50, %v215_v56  ;;  %v285_v59 = vsel %vm284_vm11, %v392_v30, %v281_v53 }
 0x12c   :  { %318 = vst [vmem:[#allocation2 + $0x28] sm:$0xff] %v310_v48  ;;  %v294_v57 = vmul.f32 %v394_v38, %v293_v51  ;;  %v306_v52 = vmul.f32 %v511_v25, %v220_v26  ;;  %v290_v60 = vsel %vm287_vm13, %v289_v54, %v285_v59 }
 0x12d   :  { %v311_v62 = vmul.f32 %v517_v27, %v290_v60 }
 0x12e   :  { %v295_v61 = vadd.f32 %v394_v38, %v294_v57  ;;  %314 = vst [vmem:[#allocation2 + $0x8] sm:$0xff] %v306_v52 }
 0x12f   :  { %319 = vst [vmem:[#allocation2 + $0x30] sm:$0xff] %v311_v62 }
 0x130   :  { %v299_v0 = vsel %vm298_vm15, %v394_v38, %v295_v61 }
 0x131   :  { %v304_v1 = vsel %vm301_vm0, %v303_v63, %v299_v0 }
 0x132   :  { %v312_v25 = vmul.f32 %v520_v28, %v304_v1 }
 0x134   :  { %320 = vst [vmem:[#allocation2 + $0x38] sm:$0xff] %v312_v25 }
 0x135   :  { %333 = dma.vmem_to_hbm [thread:$0]  %s326_s9, 1024, %s328_s12, [#allocation3], %s422_s13, %s422_s13, %s423_s14  }
 0x136   :  { %419 = dma.done.wait [#allocation3], 1024  }
 0x137   :  { %420 = vsyncadd [#allocation3], 4294966272 }
 0x138   :  { %338 = vsyncpa [#allocation3], 1 }

</bundles_post_ra>
